<compile_context>
chip_gen: v6e
topology: v6e:2x2x1
jax: 0.10.0
libtpu: 0.0.40
codegen_flags: <defaults>
</compile_context>

<pallas_src>
import jax
import jax.numpy as jnp
from jax.experimental import pallas as pl
from jax.experimental.pallas import tpu as pltpu

_EPS = 1e-8


# --------------------------------------------------------------------------
# Hardware queries (best-effort; safe fallbacks if unavailable).
# --------------------------------------------------------------------------
def _device_kind():
    try:
        return jax.devices()[0].device_kind.lower()
    except Exception:
        return ""


def _vmem_capacity_bytes():
    try:
        return int(pltpu.get_tpu_info().vmem_capacity_bytes)
    except Exception:
        return 64 * 1024 * 1024          # conservative: v7x physical VMEM


def _vmem_budget_bytes(kind):
    # v5e: smallest scoped-VMEM default (16 MiB) and lowest HBM BW -> 8 MiB.
    if "v5 lite" in kind or "v5e" in kind or "v5lite" in kind:
        return 8 * 1024 * 1024
    # v6e / v7x: faster HBM -> bigger blocks to amortize per-step overhead.
    return 16 * 1024 * 1024


def _is_multi_core_chip(kind):
    # v7x: 2 TensorCores per chip, sharded along "parallel" grid axes.
    return ("v7" in kind) or ("7x" in kind)


# --------------------------------------------------------------------------
# Kernel
# --------------------------------------------------------------------------
def _pixelnorm_kernel(x_ref, o_ref):
    # x_ref / o_ref: (Bn, C, T) tile — channels on sublanes, pixels on lanes.
    x = x_ref[...].astype(jnp.float32)
    inv_c = jnp.float32(1.0 / x_ref.shape[1])
    ssq = jnp.sum(x * x, axis=1, keepdims=True)       # (Bn, 1, T): sublane reduce (XLU)
    inv = jax.lax.rsqrt(ssq * inv_c + _EPS)           # rsqrt on EUP (free slot)
    o_ref[...] = (x * inv).astype(o_ref.dtype)        # broadcast over channels


# --------------------------------------------------------------------------
# Tiling heuristics
# --------------------------------------------------------------------------
def _choose_lane_tile(hw, c, itemsize, target_block_bytes):
    """Largest lane tile (multiple of 128) whose block fits the target size."""
    if hw <= 128:
        return hw                                     # full dim, single (masked) block
    per_128 = 128 * c * itemsize
    t = min(max(target_block_bytes // per_128, 1) * 128, hw)
    if hw % t != 0:
        # Prefer an even divisor (no masked edge block), but never collapse
        # below max(512, t // 2): one masked edge block is far cheaper than
        # shrinking every block (128-lane tiles sit at ~29% of HBM roofline).
        floor = max(512, t // 2)
        for cand in range(t - 128, floor - 1, -128):
            if hw % cand == 0:
                return cand
    return t


def _choose_batch_fold(n, lane_block_bytes, target_block_bytes):
    """Fold batch items into one block when the per-image slab is small."""
    if n <= 1 or lane_block_bytes >= target_block_bytes:
        return 1
    bn = min(n, max(1, target_block_bytes // lane_block_bytes))
    # Require an exact divisor of N so every block is full (no ragged leading
    # blocks); worst case bn == 1, which is still correct.
    while n % bn != 0:
        bn -= 1
    return max(bn, 1)


# --------------------------------------------------------------------------
# Wrapper
# --------------------------------------------------------------------------
def pixel_norm(x):
    """x: (N, C, H, W) array. Returns same shape/dtype, normalized over C."""
    N, C, H, W = x.shape
    hw = H * W
    itemsize = jnp.dtype(x.dtype).itemsize

    kind = _device_kind()
    budget = _vmem_budget_bytes(kind)
    # Target block ~budget/6: 2 pipelined arrays x 2 buffers + f32 compute
    # temporaries stay comfortably inside the scoped-VMEM limit we request.
    target_block = max(budget // 6, 128 * 1024)

    t = _choose_lane_tile(hw, C, itemsize, target_block)
    bn = _choose_batch_fold(N, C * t * itemsize, target_block) if t == hw else 1
    block_bytes = bn * C * t * itemsize

    # v7x: guarantee >= 2 grid steps along a "parallel" axis (2 TensorCores),
    # but only when there is enough work for the split to pay off.
    if (_is_multi_core_chip(kind)
            and pl.cdiv(N, bn) * pl.cdiv(hw, t) == 1
            and block_bytes >= (1 << 20)):
        if bn > 1:
            bn = max(1, bn // 2)
            while N % bn != 0:
                bn -= 1
        elif hw >= 256:
            t = pl.cdiv(pl.cdiv(hw, 2), 128) * 128
        block_bytes = bn * C * t * itemsize

    grid = (pl.cdiv(N, bn), pl.cdiv(hw, t))

    # Explicit scoped-VMEM request: double-buffered in+out pipeline plus f32
    # compute temporaries (covers very deep C where even the minimum 128-lane
    # tile would exceed the nominal budget), clamped below physical VMEM.
    f32_block = bn * C * t * 4
    vmem_cap = _vmem_capacity_bytes()
    vmem_limit = 4 * block_bytes + 3 * f32_block + (4 << 20)
    vmem_limit = int(min(max(vmem_limit, 32 << 20),
                         max(vmem_cap - (8 << 20), 16 << 20)))

    cost = pl.CostEstimate(
        flops=3 * N * C * hw,
        transcendentals=N * hw,
        bytes_accessed=2 * N * C * hw * itemsize,
    )

    x_flat = x.reshape(N, C, hw)                      # contiguous view, no transpose
    out_flat = pl.pallas_call(
        _pixelnorm_kernel,
        out_shape=jax.ShapeDtypeStruct((N, C, hw), x.dtype),
        grid_spec=pltpu.PrefetchScalarGridSpec(
            num_scalar_prefetch=0,
            grid=grid,
            in_specs=[pl.BlockSpec((bn, C, t), lambda n, s: (n, 0, s))],
            out_specs=pl.BlockSpec((bn, C, t), lambda n, s: (n, 0, s)),
        ),
        compiler_params=pltpu.CompilerParams(
            dimension_semantics=("parallel", "parallel"),
            vmem_limit_bytes=vmem_limit,
        ),
        cost_estimate=cost,
    )(x_flat)
    return out_flat.reshape(N, C, H, W)


def pixel_norm_ref(x):
    x32 = x.astype(jnp.float32)
    mean_sq = jnp.mean(x32 * x32, axis=1, keepdims=True)
    return (x32 * jax.lax.rsqrt(mean_sq + _EPS)).astype(x.dtype)


if __name__ == "__main__":
    key = jax.random.PRNGKey(0)
    k1, k2, k3 = jax.random.split(key, 3)

    # Main path: hw >= 128 (lane-dense tiles), batch folded into the block.
    x = jax.random.normal(k1, (2, 4, 16, 16), dtype=jnp.float32)
    out = pixel_norm(x)
    jax.block_until_ready(out)
    ref = pixel_norm_ref(x)
    assert out.shape == x.shape and out.dtype == x.dtype
    assert jnp.allclose(out, ref, atol=1e-5, rtol=1e-5)

    # Tiny feature maps (hw < 128): blocked in-place, no host-side transposes.
    x_small = jax.random.normal(k2, (2, 8, 4, 4), dtype=jnp.float32)
    out_small = pixel_norm(x_small)
    jax.block_until_ready(out_small)
    ref_small = pixel_norm_ref(x_small)
    assert out_small.shape == x_small.shape and out_small.dtype == x_small.dtype
    assert jnp.allclose(out_small, ref_small, atol=1e-5, rtol=1e-5)

    # Odd batch / non-multiple-of-128 spatial extent.
    x_odd = jax.random.normal(k3, (3, 6, 12, 12), dtype=jnp.float32)   # hw = 144
    out_odd = pixel_norm(x_odd)
    jax.block_until_ready(out_odd)
    ref_odd = pixel_norm_ref(x_odd)
    assert jnp.allclose(out_odd, ref_odd, atol=1e-5, rtol=1e-5)

    print("KERNEL_OK")
</pallas_src>

<mosaic_0001>
module attributes {stable_mosaic.version = 11 : i64} {
  func.func @_pixelnorm_kernel(%arg0: i32, %arg1: i32, %arg2: memref<2x4x256xf32, #tpu.memory_space<vmem>>, %arg3: memref<2x4x256xf32, #tpu.memory_space<vmem>>) attributes {dimension_semantics = [#tpu.dimension_semantics<parallel>, #tpu.dimension_semantics<parallel>], iteration_bounds = array<i64: 1, 1>, scalar_prefetch = 0 : i64, scratch_operands = 0 : i64, tpu.core_type = #tpu.core_type<tc>, window_params = [{transform_indices = @transform_0, window_bounds = array<i64: 2, 4, 256>}, {transform_indices = @transform_1, window_bounds = array<i64: 2, 4, 256>}]} {
    %c0 = arith.constant 0 : index
    %c0_0 = arith.constant 0 : index
    %c0_1 = arith.constant 0 : index
    %0 = vector.load %arg2[%c0, %c0_0, %c0_1] : memref<2x4x256xf32, #tpu.memory_space<vmem>>, vector<2x4x256xf32>
    %1 = arith.mulf %0, %0 : vector<2x4x256xf32>
    %cst = arith.constant dense<0.000000e+00> : vector<2x256xf32>
    %2 = vector.multi_reduction <add>, %1, %cst [1] : vector<2x4x256xf32> to vector<2x256xf32>
    %3 = vector.shape_cast %2 : vector<2x256xf32> to vector<2x1x256xf32>
    %cst_2 = arith.constant 2.500000e-01 : f32
    %4 = vector.broadcast %cst_2 : f32 to vector<2x1x256xf32>
    %5 = arith.mulf %3, %4 : vector<2x1x256xf32>
    %cst_3 = arith.constant 9.99999993E-9 : f32
    %6 = vector.broadcast %cst_3 : f32 to vector<2x1x256xf32>
    %7 = arith.addf %5, %6 : vector<2x1x256xf32>
    %8 = math.rsqrt %7 : vector<2x1x256xf32>
    %9 = vector.broadcast %8 : vector<2x1x256xf32> to vector<2x4x256xf32>
    %10 = arith.mulf %0, %9 : vector<2x4x256xf32>
    %c0_4 = arith.constant 0 : index
    %c0_5 = arith.constant 0 : index
    %c0_6 = arith.constant 0 : index
    %11 = vector.load %arg3[%c0_4, %c0_5, %c0_6] : memref<2x4x256xf32, #tpu.memory_space<vmem>>, vector<2x4x256xf32>
    tpu.vector_store %arg3[%c0_4, %c0_5, %c0_6], %10 {strides = array<i32>} : memref<2x4x256xf32, #tpu.memory_space<vmem>>, vector<2x4x256xf32>,
    return
  }
  func.func @transform_0(%arg0: i32, %arg1: i32) -> (i32, i32, i32) {
    %c0_i32 = arith.constant 0 : i32
    %c0_i32_0 = arith.constant 0 : i32
    return %arg0, %c0_i32, %arg1 : i32, i32, i32
  }
  func.func @transform_1(%arg0: i32, %arg1: i32) -> (i32, i32, i32) {
    %c0_i32 = arith.constant 0 : i32
    %c0_i32_0 = arith.constant 0 : i32
    return %arg0, %c0_i32, %arg1 : i32, i32, i32
  }
}

</mosaic_0001>

<bundles_post_ra>
// kernel: tpu_custom_call.1
= control target key start
LH: loop header
LB: loop body
LE: loop exit
PB: predicated region body
PF: predicated region fallthrough
CT: control target
= control target key end

     0   :  { %6 = vsyncpa [#allocation3], 0  ;;  %s185_s0 = inlined_call_operand.hbm [shape: f32[2,4,256], index: 0, kind: input, shape index: {}]   ;;  %s186_s1 = inlined_call_operand.hbm [shape: f32[2,4,256], index: 1, kind: output, shape index: {}]  }
   0x1   :  { %7 = vsyncpa [#allocation4], 0  ;;  %s159_s6 = smov [#allocation2]  }
   0x2   :  { %s13_s7 = sshll.u32 %s159_s6, 4  ;;  %s14_s7 = int_to_ptr.vmem [resolvable:$true] %s13_s7 }
   0x3   :  { %s123_s8 = scalar_lea.vmem %s14_s7, 256  ;;  %p128_p1 = scmp.lt.s32.totalorder %s14_s7, %s14_s7 }
   0x4   :  { %p124_p0 = scmp.ne.s32.totalorder %s14_s7, %s123_s8  ;;  %p129_p2 = scmp.lt.s32.totalorder %s123_s8, %s123_s8 }
   0x6   :  { %p130_p3 = por %p129_p2, %p128_p1 }
   0x8   :  { %p131_p4 = pnand %p130_p3, %p124_p0 }
   0xa   :  { %134 = shalt.err (!%p131_p4)
}
   0xb   :  { %s160_s9 = smov 128   ;;  %s161_s10 = smov 8  }
   0xc   :  { %19 = dma.hbm_to_vmem [thread:$0]  %s185_s0, 256, %s14_s7, [#allocation3], %s160_s9, %s160_s9, %s161_s10  }
   0xd   :  { %155 = dma.done.wait [#allocation3], 256  }
   0xe   :  { %156 = vsyncadd [#allocation3], 4294967040  ;;  %v23_v0 = vld [vmem:[#allocation2] sm:$0xff]  ;;  %vm33_vm0 = vcmask 1043456   ;;  %v24_v1 = vld [vmem:[#allocation2 + $0x8] sm:$0xff]  ;;  %s162_s0 = smov [#allocation5]  }
   0xf   :  { %v25_v2 = vmul.f32 %v23_v0, %v23_v0  ;;  %v26_v3 = vmul.f32 %v24_v1, %v24_v1  ;;  %s91_s13 = sshll.u32 %s162_s0, 4  ;;  %s92_s13 = int_to_ptr.vmem [resolvable:$true] %s91_s13 }
  0x10   :  { %s135_s14 = scalar_lea.vmem %s92_s13, 256  ;;  %p140_p6 = scmp.lt.s32.totalorder %s92_s13, %s92_s13 }
  0x11   :  { %v29_v4 = vcombine.high %v25_v2, %v25_v2  ;;  %v34_v5 = vsel %vm33_vm0, %v25_v2, 0.0  ;;  %v30_v6 = vcombine.high %v26_v3, %v26_v3  ;;  %v48_v7 = vsel %vm33_vm0, %v26_v3, 0.0  ;;  %p136_p5 = scmp.ne.s32.totalorder %s92_s13, %s135_s14  ;;  %p141_p7 = scmp.lt.s32.totalorder %s135_s14, %s135_s14 }
  0x12   :  { %v35_v8 = vrot.slane %v34_v5, 4  ;;  %v49_v9 = vrot.slane %v48_v7, 4 }
  0x13   :  { %v41_v10 = vsel %vm33_vm0, %v29_v4, 0.0  ;;  %v55_v11 = vsel %vm33_vm0, %v30_v6, 0.0  ;;  %p142_p8 = por %p141_p7, %p140_p6 }
  0x14   :  { %v36_v12 = vadd.f32 %v35_v8, %v34_v5  ;;  %v42_v13 = vrot.slane %v41_v10, 4  ;;  %v50_v14 = vadd.f32 %v49_v9, %v48_v7  ;;  %v56_v15 = vrot.slane %v55_v11, 4 }
  0x15   :  { %p143_p9 = pnand %p142_p8, %p136_p5 }
  0x16   :  { %v37_v16 = vrot.slane %v36_v12, 2  ;;  %v43_v17 = vadd.f32 %v42_v13, %v41_v10  ;;  %v51_v18 = vrot.slane %v50_v14, 2  ;;  %v57_v19 = vadd.f32 %v56_v15, %v55_v11 }
  0x18   :  { %v38_v20 = vadd.f32 %v37_v16, %v36_v12  ;;  %v44_v21 = vrot.slane %v43_v17, 2  ;;  %v52_v22 = vadd.f32 %v51_v18, %v50_v14  ;;  %v58_v23 = vrot.slane %v57_v19, 2 }
  0x1a   :  { %v39_v24 = vrot.slane %v38_v20, 1  ;;  %v45_v25 = vadd.f32 %v44_v21, %v43_v17  ;;  %v53_v26 = vrot.slane %v52_v22, 1  ;;  %v59_v27 = vadd.f32 %v58_v23, %v57_v19 }
  0x1c   :  { %v40_v28 = vadd.f32 %v39_v24, %v38_v20  ;;  %v46_v29 = vrot.slane %v45_v25, 1  ;;  %v54_v30 = vadd.f32 %v53_v26, %v52_v22  ;;  %v60_v31 = vrot.slane %v59_v27, 1 }
  0x1e   :  { %v47_v32 = vadd.f32 %v46_v29, %v45_v25  ;;  %v62_v33 = vmul.f32 0.25, %v40_v28  ;;  %v61_v34 = vadd.f32 %v60_v31, %v59_v27  ;;  %v64_v35 = vmul.f32 0.25, %v54_v30 }
  0x20   :  { %v63_v36 = vmul.f32 0.25, %v47_v32  ;;  %v66_v37 = vadd.f32 1e-08, %v62_v33  ;;  %v65_v38 = vmul.f32 0.25, %v61_v34  ;;  %v68_v39 = vadd.f32 1e-08, %v64_v35 }
  0x22   :  { %v67_v40 = vadd.f32 1e-08, %v63_v36  ;;  %107 = vrsqrt.f32 %v66_v37  ;;  %v69_v41 = vadd.f32 1e-08, %v65_v38 }
  0x23   :  { %109 = vrsqrt.f32 %v68_v39 }
  0x24   :  { %111 = vrsqrt.f32 %v67_v40 }
  0x25   :  { %113 = vrsqrt.f32 %v69_v41 }
  0x2f   :  { %v108_v42 = vpop.eup %107 }
  0x30   :  { %v110_v43 = vpop.eup %109 }
  0x31   :  { %v112_v44 = vpop.eup %111 }
  0x32   :  { %v114_v45 = vpop.eup %113  ;;  %v78_v46 = vcombine.low %v108_v42, %v112_v44 }
  0x33   :  { %v79_v47 = vcombine.low %v110_v43, %v114_v45 }
  0x34   :  { %v82_v48 = vmul.f32 %v78_v46, %v23_v0 }
  0x35   :  { %v83_v49 = vmul.f32 %v79_v47, %v24_v1 }
  0x36   :  { %84 = vst [vmem:[#allocation5] sm:$0xff] %v82_v48 }
  0x37   :  { %85 = vst [vmem:[#allocation5 + $0x8] sm:$0xff] %v83_v49 }
  0x38   :  { %146 = shalt.err (!%p143_p9)
}
  0x39   :  { %97 = dma.vmem_to_hbm [thread:$0]  %s92_s13, 256, %s186_s1, [#allocation4], %s160_s9, %s160_s9, %s161_s10  }
  0x3a   :  { %157 = dma.done.wait [#allocation4], 256  }
  0x3b   :  { %158 = vsyncadd [#allocation4], 4294967040 }
  0x3c   :  { %101 = vsyncpa [#allocation3], 1 }
  0x3d   :  { %102 = vsyncpa [#allocation4], 1 }

</bundles_post_ra>
